<compile_context>
chip_gen: v7x
topology: tpu7x:2x2x1
jax: 0.10.0
libtpu: 0.0.40
codegen_flags: <defaults>
</compile_context>

<pallas_src>
import jax
import jax.numpy as jnp
from jax.experimental import pallas as pl
from jax.experimental.pallas import tpu as pltpu


# ---------------------------------------------------------------------------
# Fused kernel: global-average-pool (recomputed per F-tile) + fc1 matmul tile.
# ---------------------------------------------------------------------------
def fused_pool_fc1_kernel(x_ref, w_ref, b_ref, o_ref):
    # x_ref: (B, C, S) full backbone feature map (constant index_map -> stays VMEM
    #        resident across F-tiles; DMA'd at most once per TensorCore).
    # w_ref: (C, TF) bf16 weight tile; b_ref: (1, TF) f32 bias tile; o_ref: (B, TF).
    x = x_ref[...].astype(jnp.float32)                  # (B, C, S)
    inv_s = 1.0 / x.shape[-1]
    # AdaptiveAvgPool2d((1,1)) + flatten, recomputed per F-tile (avoids any pool-once
    # hazard under "parallel" grid semantics; the cheap XLU reduce overlaps the
    # dominant weight-tile DMA stream in this memory-bound kernel).
    pooled = (jnp.sum(x, axis=-1) * inv_s).astype(w_ref.dtype)      # (B, C) bf16
    acc = jnp.dot(pooled, w_ref[...], preferred_element_type=jnp.float32)
    o_ref[...] = (acc + b_ref[...].astype(jnp.float32)).astype(o_ref.dtype)


def _pick_tile_f(C, F, wbytes=2):
    """Largest F-tile whose double-buffered weight tile stays ~<=16 MiB (safe on every
    generation: ~1/4 of v7x's 64 MiB per-TC VMEM, tiny vs. v5e/v6e's 128 MiB), capped
    at 2048 and kept a multiple of 256 (MXU-native) that divides F."""
    budget = 16 * 1024 * 1024
    tf = budget // (2 * C * wbytes)
    tf = min(tf, F, 2048)
    tf = max((tf // 256) * 256, 256)
    tf = min(tf, F)
    while tf > 0 and F % tf != 0:
        tf -= 128
    return tf if tf > 0 else F


def fused_pool_fc1(x_bcs, w, b2d, *, tile_f=None, out_dtype=jnp.float32):
    """x_bcs: (B, C, S) feature map, w: (C, F) bf16, b2d: (1, F) f32  ->  (B, F)."""
    B, C, S = x_bcs.shape
    F = w.shape[1]
    assert w.shape[0] == C and b2d.shape == (1, F)

    if tile_f is None:
        tile_f = _pick_tile_f(C, F, wbytes=w.dtype.itemsize)
    tile_f = min(tile_f, F)
    assert F % tile_f == 0, "F must be divisible by tile_f"
    grid = (F // tile_f,)

    xbytes = x_bcs.dtype.itemsize
    wbytes = w.dtype.itemsize
    bbytes = b2d.dtype.itemsize
    obytes = jnp.dtype(out_dtype).itemsize

    # Tight VMEM budget: double-buffered weight/bias/output tiles + the (lane-padded)
    # feature-map block, plus a few MiB of headroom for Mosaic internal scratch.
    s_pad = ((S + 127) // 128) * 128
    vmem_need = (
        2 * (C * tile_f * wbytes + 8 * tile_f * bbytes + max(B, 8) * tile_f * obytes)
        + 2 * B * C * s_pad * xbytes
    )
    vmem_limit = int(vmem_need + 8 * 1024 * 1024)

    return pl.pallas_call(
        fused_pool_fc1_kernel,
        out_shape=jax.ShapeDtypeStruct((B, F), out_dtype),
        grid=grid,
        in_specs=[
            pl.BlockSpec((B, C, S), lambda j: (0, 0, 0)),   # feature map, VMEM-resident
            pl.BlockSpec((C, tile_f), lambda j: (0, j)),    # fc1 weight tile
            pl.BlockSpec((1, tile_f), lambda j: (0, j)),    # fc1 bias tile
        ],
        out_specs=pl.BlockSpec((B, tile_f), lambda j: (0, j)),   # lane-dense output
        compiler_params=pltpu.CompilerParams(
            dimension_semantics=("parallel",),    # F-tiles shard across v7x's two TCs
            vmem_limit_bytes=vmem_limit,
        ),
        cost_estimate=pl.CostEstimate(
            flops=2 * B * C * F + grid[0] * B * C * S,
            transcendentals=0,
            bytes_accessed=C * F * wbytes + B * C * S * xbytes + F * bbytes + B * F * obytes,
        ),
    )(x_bcs, w, b2d)


# ---------------------------------------------------------------------------
# EmbeddingNet forward (minus the externally-provided ResNet-101 conv trunk).
# ---------------------------------------------------------------------------
def embedding_net_forward(feat_nchw, w_fc1, b_fc1, *, tile_f=None,
                          compute_dtype=jnp.bfloat16):
    """feat_nchw: (B, C, H, W) backbone feature maps (NCHW, as PyTorch produces).
    w_fc1: (C, F), b_fc1: (F,). Returns (B, F) in feat_nchw.dtype."""
    B, C, H, W = feat_nchw.shape
    F = w_fc1.shape[1]
    assert w_fc1.shape[0] == C

    x = feat_nchw.reshape(B, C, H * W)                 # contiguous reshape, no transpose
    w = w_fc1.astype(compute_dtype)                    # bf16 weight stream (dominant read)
    b2d = b_fc1.reshape(1, F).astype(jnp.float32)      # bias stays f32
    return fused_pool_fc1(x, w, b2d, tile_f=tile_f, out_dtype=feat_nchw.dtype)


if __name__ == "__main__":
    # Small, TPU-friendly stand-in shapes for the real ResNet-101 sizes
    # (real: B x 2048 x 7 x 7 backbone features -> fc1 out = 4096).
    B, C, H, W = 2, 256, 8, 8
    F = 512

    key = jax.random.PRNGKey(0)
    kx, kw, kb = jax.random.split(key, 3)

    # Deterministic synthetic backbone feature maps (NCHW, as the trunk would emit).
    x = jax.random.normal(kx, (B, C, H, W), dtype=jnp.float32)

    # fc1 parameters: nn.Linear(num_ftrs, 4096) -> torch weight (F, C); we store (C, F).
    w_fc1 = jax.random.normal(kw, (C, F), dtype=jnp.float32) / jnp.sqrt(C)
    b_fc1 = jax.random.normal(kb, (F,), dtype=jnp.float32) * 0.01

    out = embedding_net_forward(x, w_fc1, b_fc1)
    out = jax.block_until_ready(out)

    # Pure-JAX reference using the same bf16 quantization of pooled features / weights.
    pooled_ref = jnp.mean(x, axis=(2, 3)).astype(jnp.bfloat16).astype(jnp.float32)
    w_ref = w_fc1.astype(jnp.bfloat16).astype(jnp.float32)
    ref = pooled_ref @ w_ref + b_fc1

    assert out.shape == (B, F)
    assert jnp.allclose(out, ref, atol=2e-2, rtol=2e-2), float(jnp.max(jnp.abs(out - ref)))

    print("KERNEL_OK")
</pallas_src>

<mosaic_0001>
module attributes {stable_mosaic.version = 11 : i64} {
  func.func @fused_pool_fc1_kernel(%arg0: i32, %arg1: memref<2x256x64xf32, #tpu.memory_space<vmem>>, %arg2: memref<256x512xbf16, #tpu.memory_space<vmem>>, %arg3: memref<1x512xf32, #tpu.memory_space<vmem>>, %arg4: memref<2x512xf32, #tpu.memory_space<vmem>>) attributes {dimension_semantics = [#tpu.dimension_semantics<parallel>], iteration_bounds = array<i64: 1>, scalar_prefetch = 0 : i64, scratch_operands = 0 : i64, tpu.core_type = #tpu.core_type<tc>, window_params = [{pipeline_mode = #tpu.pipeline_mode<synchronous>, transform_indices = @transform_0, window_bounds = array<i64: 2, 256, 64>}, {transform_indices = @transform_1, window_bounds = array<i64: 256, 512>}, {transform_indices = @transform_2, window_bounds = array<i64: 1, 512>}, {transform_indices = @transform_3, window_bounds = array<i64: 2, 512>}]} {
    %c0 = arith.constant 0 : index
    %c0_0 = arith.constant 0 : index
    %c0_1 = arith.constant 0 : index
    %0 = vector.load %arg1[%c0, %c0_0, %c0_1] : memref<2x256x64xf32, #tpu.memory_space<vmem>>, vector<2x256x64xf32>
    %cst = arith.constant dense<0.000000e+00> : vector<2x256xf32>
    %1 = vector.multi_reduction <add>, %0, %cst [2] : vector<2x256x64xf32> to vector<2x256xf32>
    %cst_2 = arith.constant 1.562500e-02 : f32
    %2 = vector.broadcast %cst_2 : f32 to vector<2x256xf32>
    %3 = arith.mulf %1, %2 : vector<2x256xf32>
    %4 = arith.truncf %3 : vector<2x256xf32> to vector<2x256xbf16>
    %c0_3 = arith.constant 0 : index
    %c0_4 = arith.constant 0 : index
    %5 = vector.load %arg2[%c0_3, %c0_4] : memref<256x512xbf16, #tpu.memory_space<vmem>>, vector<256x512xbf16>
    %cst_5 = arith.constant dense<0.000000e+00> : vector<2x512xf32>
    %6 = tpu.matmul %4, %5, %cst_5 {dimension_numbers = #tpu.dot_dimension_numbers<[1], [0], [0], [1], [0, 0, 1, 1], [], []>} : vector<2x256xbf16>, vector<256x512xbf16>, vector<2x512xf32> -> vector<2x512xf32>
    %c0_6 = arith.constant 0 : index
    %c0_7 = arith.constant 0 : index
    %7 = vector.load %arg3[%c0_6, %c0_7] : memref<1x512xf32, #tpu.memory_space<vmem>>, vector<1x512xf32>
    %8 = vector.broadcast %7 : vector<1x512xf32> to vector<2x512xf32>
    %9 = arith.addf %6, %8 : vector<2x512xf32>
    %c0_8 = arith.constant 0 : index
    %c0_9 = arith.constant 0 : index
    %10 = vector.load %arg4[%c0_8, %c0_9] : memref<2x512xf32, #tpu.memory_space<vmem>>, vector<2x512xf32>
    tpu.vector_store %arg4[%c0_8, %c0_9], %9 {strides = array<i32>} : memref<2x512xf32, #tpu.memory_space<vmem>>, vector<2x512xf32>,
    return
  }
  func.func @transform_0(%arg0: i32) -> (i32, i32, i32) {
    %c0_i32 = arith.constant 0 : i32
    %c0_i32_0 = arith.constant 0 : i32
    %c0_i32_1 = arith.constant 0 : i32
    %c0_i32_2 = arith.constant 0 : i32
    return %c0_i32, %c0_i32_0, %c0_i32_1 : i32, i32, i32
  }
  func.func @transform_1(%arg0: i32) -> (i32, i32) {
    %c0_i32 = arith.constant 0 : i32
    %c0_i32_0 = arith.constant 0 : i32
    return %c0_i32, %arg0 : i32, i32
  }
  func.func @transform_2(%arg0: i32) -> (i32, i32) {
    %c0_i32 = arith.constant 0 : i32
    %c0_i32_0 = arith.constant 0 : i32
    return %c0_i32, %arg0 : i32, i32
  }
  func.func @transform_3(%arg0: i32) -> (i32, i32) {
    %c0_i32 = arith.constant 0 : i32
    %c0_i32_0 = arith.constant 0 : i32
    return %c0_i32, %arg0 : i32, i32
  }
}

</mosaic_0001>

<bundles_post_ra>
// kernel: tpu_custom_call.1
= control target key start
LH: loop header
LB: loop body
LE: loop exit
PB: predicated region body
PF: predicated region fallthrough
CT: control target
= control target key end

     0   :  { %vm79_vm0 = vcmask 523264   ;;  %s2229_s0 = inlined_call_operand.vmem [shape: f32[2,256,64], index: 0, kind: input, shape index: {}]   ;;  %s2230_s1 = inlined_call_operand.vmem [shape: bf16[256,512], index: 1, kind: input, shape index: {}]   ;;  %s2231_s2 = inlined_call_operand.vmem [shape: f32[1,512], index: 2, kind: input, shape index: {}]   ;;  %s2232_s3 = inlined_call_operand.hbm [shape: f32[2,512], index: 3, kind: output, shape index: {}]  }
   0x1   :  { %v63_v0 = vld [vmem:[%s2229_s0 + $0x180] sm:$0xff]  ;;  %v64_v2 = vld [vmem:[%s2229_s0 + $0x188] sm:$0xff]  ;;  %v34_v12 = vld [vmem:[%s2229_s0 + $0x98] sm:$0xff] }
   0x2   :  { %v31_v1 = vld [vmem:[%s2229_s0 + $0x80] sm:$0xff]  ;;  %v224_v3 = vsel %vm79_vm0, %v63_v0, 0.0  ;;  %v32_v5 = vld [vmem:[%s2229_s0 + $0x88] sm:$0xff]  ;;  %v227_v6 = vsel %vm79_vm0, %v64_v2, 0.0  ;;  %v33_v13 = vld [vmem:[%s2229_s0 + $0x90] sm:$0xff]  ;;  %v137_v14 = vsel %vm79_vm0, %v34_v12, 0.0 }
   0x3   :  { %v128_v4 = vsel %vm79_vm0, %v31_v1, 0.0  ;;  %225 = vadd.xlane.f32.xlu1 %v224_v3  ;;  %v131_v7 = vsel %vm79_vm0, %v32_v5, 0.0  ;;  %v16_v8 = vld [vmem:[%s2229_s0 + $0x8] sm:$0xff]  ;;  %v15_v9 = vld [vmem:[%s2229_s0] sm:$0xff]  ;;  %v134_v15 = vsel %vm79_vm0, %v33_v13, 0.0  ;;  %v66_v20 = vld [vmem:[%s2229_s0 + $0x198] sm:$0xff] }
   0x4   :  { %129 = vadd.xlane.f32.xlu0 %v128_v4  ;;  %v83_v10 = vsel %vm79_vm0, %v16_v8, 0.0  ;;  %v80_v11 = vsel %vm79_vm0, %v15_v9, 0.0  ;;  %v48_v16 = vld [vmem:[%s2229_s0 + $0x108] sm:$0xff]  ;;  %v47_v17 = vld [vmem:[%s2229_s0 + $0x100] sm:$0xff]  ;;  %v65_v21 = vld [vmem:[%s2229_s0 + $0x190] sm:$0xff]  ;;  %v233_v22 = vsel %vm79_vm0, %v66_v20, 0.0 }
   0x5   :  { %v179_v18 = vsel %vm79_vm0, %v48_v16, 0.0  ;;  %v176_v19 = vsel %vm79_vm0, %v47_v17, 0.0  ;;  %v230_v23 = vsel %vm79_vm0, %v65_v21, 0.0  ;;  %v18_v24 = vld [vmem:[%s2229_s0 + $0x18] sm:$0xff]  ;;  %v17_v25 = vld [vmem:[%s2229_s0 + $0x10] sm:$0xff]  ;;  %v36_v30 = vld [vmem:[%s2229_s0 + $0xa8] sm:$0xff] }
   0x6   :  { %v50_v26 = vld [vmem:[%s2229_s0 + $0x118] sm:$0xff]  ;;  %v49_v27 = vld [vmem:[%s2229_s0 + $0x110] sm:$0xff]  ;;  %v89_v28 = vsel %vm79_vm0, %v18_v24, 0.0  ;;  %v86_v29 = vsel %vm79_vm0, %v17_v25, 0.0  ;;  %v35_v31 = vld [vmem:[%s2229_s0 + $0xa0] sm:$0xff]  ;;  %v143_v36 = vsel %vm79_vm0, %v36_v30, 0.0 }
   0x7   :  { %228 = vadd.xlane.f32.xlu1 %v227_v6  ;;  %v185_v32 = vsel %vm79_vm0, %v50_v26, 0.0  ;;  %v182_v33 = vsel %vm79_vm0, %v49_v27, 0.0  ;;  %v68_v34 = vld [vmem:[%s2229_s0 + $0x1a8] sm:$0xff]  ;;  %v67_v35 = vld [vmem:[%s2229_s0 + $0x1a0] sm:$0xff]  ;;  %v140_v37 = vsel %vm79_vm0, %v35_v31, 0.0 }
   0x8   :  { %132 = vadd.xlane.f32.xlu0 %v131_v7  ;;  %v20_v38 = vld [vmem:[%s2229_s0 + $0x28] sm:$0xff]  ;;  %v19_v39 = vld [vmem:[%s2229_s0 + $0x20] sm:$0xff]  ;;  %v239_v40 = vsel %vm79_vm0, %v68_v34, 0.0  ;;  %v236_v41 = vsel %vm79_vm0, %v67_v35, 0.0 }
   0x9   :  { %v52_v42 = vld [vmem:[%s2229_s0 + $0x128] sm:$0xff]  ;;  %v51_v43 = vld [vmem:[%s2229_s0 + $0x120] sm:$0xff]  ;;  %v95_v44 = vsel %vm79_vm0, %v20_v38, 0.0  ;;  %v92_v45 = vsel %vm79_vm0, %v19_v39, 0.0 }
   0xa   :  { %v191_v46 = vsel %vm79_vm0, %v52_v42, 0.0  ;;  %v188_v47 = vsel %vm79_vm0, %v51_v43, 0.0 }
   0xb   :  { %84 = vadd.xlane.f32.xlu1 %v83_v10 }
   0xc   :  { %81 = vadd.xlane.f32.xlu0 %v80_v11 }
   0xf   :  { %138 = vadd.xlane.f32.xlu1 %v137_v14 }
  0x10   :  { %135 = vadd.xlane.f32.xlu0 %v134_v15 }
  0x13   :  { %180 = vadd.xlane.f32.xlu1 %v179_v18 }
  0x14   :  { %177 = vadd.xlane.f32.xlu0 %v176_v19 }
  0x17   :  { %234 = vadd.xlane.f32.xlu1 %v233_v22 }
  0x18   :  { %231 = vadd.xlane.f32.xlu0 %v230_v23 }
  0x1b   :  { %90 = vadd.xlane.f32.xlu1 %v89_v28 }
  0x1c   :  { %87 = vadd.xlane.f32.xlu0 %v86_v29 }
  0x1f   :  { %186 = vadd.xlane.f32.xlu1 %v185_v32 }
  0x20   :  { %183 = vadd.xlane.f32.xlu0 %v182_v33 }
  0x23   :  { %144 = vadd.xlane.f32.xlu1 %v143_v36 }
  0x24   :  { %141 = vadd.xlane.f32.xlu0 %v140_v37 }
  0x27   :  { %240 = vadd.xlane.f32.xlu1 %v239_v40 }
  0x28   :  { %237 = vadd.xlane.f32.xlu0 %v236_v41 }
  0x2b   :  { %96 = vadd.xlane.f32.xlu1 %v95_v44 }
  0x2c   :  { %93 = vadd.xlane.f32.xlu0 %v92_v45 }
  0x2d   :  { %8 = vsyncpa [#allocation3], 0  ;;  %v38_v48 = vld [vmem:[%s2229_s0 + $0xb8] sm:$0xff]  ;;  %v37_v49 = vld [vmem:[%s2229_s0 + $0xb0] sm:$0xff]  ;;  %vm561_vm1 = vcmask 130112   ;;  %vm568_vm2 = vcmask 195712  }
  0x2e   :  { %v149_v50 = vsel %vm79_vm0, %v38_v48, 0.0  ;;  %v146_v51 = vsel %vm79_vm0, %v37_v49, 0.0  ;;  %v70_v52 = vld [vmem:[%s2229_s0 + $0x1b8] sm:$0xff]  ;;  %v69_v53 = vld [vmem:[%s2229_s0 + $0x1b0] sm:$0xff]  ;;  %v40_v0 = vld [vmem:[%s2229_s0 + $0xc8] sm:$0xff]  ;;  %vm575_vm3 = vcmask 261312  }
  0x2f   :  { %192 = vadd.xlane.f32.xlu1 %v191_v46  ;;  %v245_v54 = vsel %vm79_vm0, %v70_v52, 0.0  ;;  %v242_v55 = vsel %vm79_vm0, %v69_v53, 0.0  ;;  %v22_v56 = vld [vmem:[%s2229_s0 + $0x38] sm:$0xff]  ;;  %v21_v57 = vld [vmem:[%s2229_s0 + $0x30] sm:$0xff]  ;;  %v39_v1 = vld [vmem:[%s2229_s0 + $0xc0] sm:$0xff]  ;;  %v155_v2 = vsel %vm79_vm0, %v40_v0, 0.0 }
  0x30   :  { %189 = vadd.xlane.f32.xlu0 %v188_v47  ;;  %v101_v58 = vsel %vm79_vm0, %v22_v56, 0.0  ;;  %v98_v59 = vsel %vm79_vm0, %v21_v57, 0.0  ;;  %v54_v60 = vld [vmem:[%s2229_s0 + $0x138] sm:$0xff]  ;;  %v53_v61 = vld [vmem:[%s2229_s0 + $0x130] sm:$0xff]  ;;  %v152_v3 = vsel %vm79_vm0, %v39_v1, 0.0  ;;  %v72_v4 = vld [vmem:[%s2229_s0 + $0x1c8] sm:$0xff] }
  0x31   :  { %v197_v62 = vsel %vm79_vm0, %v54_v60, 0.0  ;;  %v194_v63 = vsel %vm79_vm0, %v53_v61, 0.0  ;;  %v71_v5 = vld [vmem:[%s2229_s0 + $0x1c0] sm:$0xff]  ;;  %v251_v6 = vsel %vm79_vm0, %v72_v4, 0.0  ;;  %v24_v8 = vld [vmem:[%s2229_s0 + $0x48] sm:$0xff]  ;;  %v42_v16 = vld [vmem:[%s2229_s0 + $0xd8] sm:$0xff] }
  0x32   :  { %v248_v7 = vsel %vm79_vm0, %v71_v5, 0.0  ;;  %v23_v9 = vld [vmem:[%s2229_s0 + $0x40] sm:$0xff]  ;;  %v107_v10 = vsel %vm79_vm0, %v24_v8, 0.0  ;;  %v56_v12 = vld [vmem:[%s2229_s0 + $0x148] sm:$0xff]  ;;  %v41_v17 = vld [vmem:[%s2229_s0 + $0xd0] sm:$0xff]  ;;  %v161_v18 = vsel %vm79_vm0, %v42_v16, 0.0 }
  0x33   :  { %150 = vadd.xlane.f32.xlu1 %v149_v50  ;;  %v104_v11 = vsel %vm79_vm0, %v23_v9, 0.0  ;;  %v55_v13 = vld [vmem:[%s2229_s0 + $0x140] sm:$0xff]  ;;  %v203_v14 = vsel %vm79_vm0, %v56_v12, 0.0  ;;  %v158_v19 = vsel %vm79_vm0, %v41_v17, 0.0  ;;  %v74_v20 = vld [vmem:[%s2229_s0 + $0x1d8] sm:$0xff]  ;;  %v73_v21 = vld [vmem:[%s2229_s0 + $0x1d0] sm:$0xff] }
  0x34   :  { %147 = vadd.xlane.f32.xlu0 %v146_v51  ;;  %v200_v15 = vsel %vm79_vm0, %v55_v13, 0.0  ;;  %v257_v22 = vsel %vm79_vm0, %v74_v20, 0.0  ;;  %v254_v23 = vsel %vm79_vm0, %v73_v21, 0.0  ;;  %v26_v24 = vld [vmem:[%s2229_s0 + $0x58] sm:$0xff]  ;;  %v25_v25 = vld [vmem:[%s2229_s0 + $0x50] sm:$0xff]  ;;  %v44_v36 = vld [vmem:[%s2229_s0 + $0xe8] sm:$0xff] }
  0x35   :  { %v113_v26 = vsel %vm79_vm0, %v26_v24, 0.0  ;;  %v110_v27 = vsel %vm79_vm0, %v25_v25, 0.0  ;;  %v58_v28 = vld [vmem:[%s2229_s0 + $0x158] sm:$0xff]  ;;  %v57_v29 = vld [vmem:[%s2229_s0 + $0x150] sm:$0xff]  ;;  %v43_v37 = vld [vmem:[%s2229_s0 + $0xe0] sm:$0xff]  ;;  %v167_v42 = vsel %vm79_vm0, %v44_v36, 0.0 }
  0x36   :  { %v1410_v30 = vld [vmem:[%s2230_s1 + $0x4] ss:$16 sps:$4 sm:$0xff]   ;;  %v1412_v31 = vld [vmem:[%s2230_s1 + $0xc] ss:$16 sps:$4 sm:$0xff]   ;;  %v1414_v32 = vld [vmem:[%s2230_s1] ss:$16 sps:$4 sm:$0xff]  }
  0x37   :  { %246 = vadd.xlane.f32.xlu1 %v245_v54  ;;  %v1415_v33 = vld [vmem:[%s2230_s1 + $0x8] ss:$16 sps:$4 sm:$0xff]   ;;  %v209_v34 = vsel %vm79_vm0, %v58_v28, 0.0  ;;  %v206_v35 = vsel %vm79_vm0, %v57_v29, 0.0  ;;  %1225 = vmatprep.subr.bf16.mxu0 %v1410_v30  ;;  %v1416_v38 = vld [vmem:[%s2230_s1 + $0x24] ss:$16 sps:$4 sm:$0xff]  }
  0x38   :  { %243 = vadd.xlane.f32.xlu0 %v242_v55  ;;  %1266 = vmatprep.subr.bf16.mxu1 %v1412_v31  ;;  %v1418_v39 = vld [vmem:[%s2230_s1 + $0x2c] ss:$16 sps:$4 sm:$0xff]   ;;  %v1420_v40 = vld [vmem:[%s2230_s1 + $0x20] ss:$16 sps:$4 sm:$0xff]   ;;  %v1421_v41 = vld [vmem:[%s2230_s1 + $0x28] ss:$16 sps:$4 sm:$0xff]  }
  0x39   :  { %1226 = vmatpush1.bf16.msra.mxu0 %v1414_v32  ;;  %1267 = vmatpush1.bf16.msra.mxu1 %v1415_v33  ;;  %v164_v43 = vsel %vm79_vm0, %v43_v37, 0.0  ;;  %v76_v44 = vld [vmem:[%s2229_s0 + $0x1e8] sm:$0xff]  ;;  %v75_v45 = vld [vmem:[%s2229_s0 + $0x1e0] sm:$0xff]  ;;  %v46_v4 = vld [vmem:[%s2229_s0 + $0xf8] sm:$0xff]  ;;  %vm582_vm4 = vcmask 326912   ;;  %vm589_vm5 = vcmask 392512  }
  0x3a   :  { %1227 = vmatprep.subr.bf16.mxu0 %v1416_v38  ;;  %1268 = vmatprep.subr.bf16.mxu1 %v1418_v39  ;;  %v1422_v46 = vld [vmem:[%s2230_s1 + $0x44] ss:$16 sps:$4 sm:$0xff]   ;;  %v1424_v47 = vld [vmem:[%s2230_s1 + $0x4c] ss:$16 sps:$4 sm:$0xff]   ;;  %v1426_v48 = vld [vmem:[%s2230_s1 + $0x40] ss:$16 sps:$4 sm:$0xff]  }
  0x3b   :  { %102 = vadd.xlane.f32.xlu1 %v101_v58  ;;  %v1427_v49 = vld [vmem:[%s2230_s1 + $0x48] ss:$16 sps:$4 sm:$0xff]   ;;  %v263_v50 = vsel %vm79_vm0, %v76_v44, 0.0  ;;  %v260_v51 = vsel %vm79_vm0, %v75_v45, 0.0  ;;  %v27_v53 = vld [vmem:[%s2229_s0 + $0x60] sm:$0xff]  ;;  %v45_v5 = vld [vmem:[%s2229_s0 + $0xf0] sm:$0xff] }
  0x3c   :  { %99 = vadd.xlane.f32.xlu0 %v98_v59  ;;  %v28_v52 = vld [vmem:[%s2229_s0 + $0x68] sm:$0xff]  ;;  %v1428_v54 = vld [vmem:[%s2230_s1 + $0x64] ss:$16 sps:$4 sm:$0xff]   ;;  %v1432_v56 = vld [vmem:[%s2230_s1 + $0x60] ss:$16 sps:$4 sm:$0xff]   ;;  %v116_v59 = vsel %vm79_vm0, %v27_v53, 0.0 }
  0x3d   :  { %1228 = vmatpush1.bf16.msra.mxu0 %v1420_v40  ;;  %1269 = vmatpush1.bf16.msra.mxu1 %v1421_v41  ;;  %v1430_v55 = vld [vmem:[%s2230_s1 + $0x6c] ss:$16 sps:$4 sm:$0xff]   ;;  %v1433_v57 = vld [vmem:[%s2230_s1 + $0x68] ss:$16 sps:$4 sm:$0xff]   ;;  %v119_v58 = vsel %vm79_vm0, %v28_v52, 0.0  ;;  %v59_v61 = vld [vmem:[%s2229_s0 + $0x160] sm:$0xff] }
  0x3e   :  { %1229 = vmatprep.subr.bf16.mxu0 %v1422_v46  ;;  %1270 = vmatprep.subr.bf16.mxu1 %v1424_v47  ;;  %v60_v60 = vld [vmem:[%s2229_s0 + $0x168] sm:$0xff]  ;;  %v1438_v0 = vld [vmem:[%s2230_s1 + $0x80] ss:$16 sps:$4 sm:$0xff]   ;;  %v78_v12 = vld [vmem:[%s2229_s0 + $0x1f8] sm:$0xff]  ;;  %vm596_vm6 = vcmask 458112   ;;  %vm603_vm7 = vcmask 523712  }
  0x3f   :  { %198 = vadd.xlane.f32.xlu1 %v197_v62  ;;  %v1434_v62 = vld [vmem:[%s2230_s1 + $0x84] ss:$16 sps:$4 sm:$0xff]   ;;  %v1439_v1 = vld [vmem:[%s2230_s1 + $0x88] ss:$16 sps:$4 sm:$0xff]   ;;  %v1444_v8 = vld [vmem:[%s2230_s1 + $0xa0] ss:$16 sps:$4 sm:$0xff]  }
  0x40   :  { %195 = vadd.xlane.f32.xlu0 %v194_v63  ;;  %v1436_v63 = vld [vmem:[%s2230_s1 + $0x8c] ss:$16 sps:$4 sm:$0xff]   ;;  %v1445_v9 = vld [vmem:[%s2230_s1 + $0xa8] ss:$16 sps:$4 sm:$0xff]   ;;  %v77_v13 = vld [vmem:[%s2229_s0 + $0x1f0] sm:$0xff]  ;;  %vm610_vm8 = vcmask 589312  }
  0x41   :  { %1230 = vmatpush1.bf16.msra.mxu0 %v1426_v48  ;;  %1271 = vmatpush1.bf16.msra.mxu1 %v1427_v49  ;;  %v1450_v16 = vld [vmem:[%s2230_s1 + $0xc0] ss:$16 sps:$4 sm:$0xff]   ;;  %v1451_v17 = vld [vmem:[%s2230_s1 + $0xc8] ss:$16 sps:$4 sm:$0xff]   ;;  %v1458_v30 = vld [vmem:[%s2230_s1 + $0x104] ss:$16 sps:$4 sm:$0xff]  }
  0x42   :  { %1231 = vmatprep.subr.bf16.mxu0 %v1428_v54  ;;  %1272 = vmatprep.subr.bf16.mxu1 %v1430_v55  ;;  %v30_v20 = vld [vmem:[%s2229_s0 + $0x78] sm:$0xff]  ;;  %v29_v21 = vld [vmem:[%s2229_s0 + $0x70] sm:$0xff]  ;;  %vm617_vm9 = vcmask 654912   ;;  %vm624_vm10 = vcmask 720512   ;;  %vm631_vm11 = vcmask 786112   ;;  %vm638_vm12 = vcmask 851712  }
  0x43   :  { %156 = vadd.xlane.f32.xlu1 %v155_v2  ;;  %v215_v2 = vsel %vm79_vm0, %v60_v60, 0.0  ;;  %v1456_v24 = vld [vmem:[%s2230_s1 + $0xe0] ss:$16 sps:$4 sm:$0xff]   ;;  %v1457_v25 = vld [vmem:[%s2230_s1 + $0xe8] ss:$16 sps:$4 sm:$0xff]   ;;  %vm645_vm13 = vcmask 917312  }
  0x44   :  { %153 = vadd.xlane.f32.xlu0 %v152_v3  ;;  %v212_v3 = vsel %vm79_vm0, %v59_v61, 0.0  ;;  %v62_v28 = vld [vmem:[%s2229_s0 + $0x178] sm:$0xff]  ;;  %v61_v29 = vld [vmem:[%s2229_s0 + $0x170] sm:$0xff]  ;;  %vm652_vm14 = vcmask 982912   ;;  %vm659_vm15 = vcmask 1048512  }
  0x45   :  { %1232 = vmatpush1.bf16.msra.mxu0 %v1432_v56  ;;  %1273 = vmatpush1.bf16.msra.mxu1 %v1433_v57  ;;  %v1460_v31 = vld [vmem:[%s2230_s1 + $0x10c] ss:$16 sps:$4 sm:$0xff]   ;;  %v1462_v32 = vld [vmem:[%s2230_s1 + $0x100] ss:$16 sps:$4 sm:$0xff]   ;;  %v1463_v33 = vld [vmem:[%s2230_s1 + $0x108] ss:$16 sps:$4 sm:$0xff]  }
  0x46   :  { %1233 = vmatprep.subr.bf16.mxu0 %v1434_v62  ;;  %1274 = vmatprep.subr.bf16.mxu1 %v1436_v63  ;;  %v1464_v36 = vld [vmem:[%s2230_s1 + $0x124] ss:$16 sps:$4 sm:$0xff]   ;;  %v1466_v37 = vld [vmem:[%s2230_s1 + $0x12c] ss:$16 sps:$4 sm:$0xff]   ;;  %v1468_v38 = vld [vmem:[%s2230_s1 + $0x120] ss:$16 sps:$4 sm:$0xff]  }
  0x47   :  { %252 = vadd.xlane.f32.xlu1 %v251_v6  ;;  %v1440_v6 = vld [vmem:[%s2230_s1 + $0xa4] ss:$16 sps:$4 sm:$0xff]   ;;  %v1469_v39 = vld [vmem:[%s2230_s1 + $0x128] ss:$16 sps:$4 sm:$0xff]   ;;  %v1472_v41 = vld [vmem:[%s2230_s1 + $0x14c] ss:$16 sps:$4 sm:$0xff]  }
  0x48   :  { %249 = vadd.xlane.f32.xlu0 %v248_v7  ;;  %v1442_v7 = vld [vmem:[%s2230_s1 + $0xac] ss:$16 sps:$4 sm:$0xff]   ;;  %v1470_v40 = vld [vmem:[%s2230_s1 + $0x144] ss:$16 sps:$4 sm:$0xff]   ;;  %v1480_v46 = vld [vmem:[%s2230_s1 + $0x160] ss:$16 sps:$4 sm:$0xff]  }
  0x49   :  { %1234 = vmatpush1.bf16.msra.mxu0 %v1438_v0  ;;  %1275 = vmatpush1.bf16.msra.mxu1 %v1439_v1  ;;  %v1476_v44 = vld [vmem:[%s2230_s1 + $0x164] ss:$16 sps:$4 sm:$0xff]   ;;  %v1478_v45 = vld [vmem:[%s2230_s1 + $0x16c] ss:$16 sps:$4 sm:$0xff]   ;;  %v1481_v47 = vld [vmem:[%s2230_s1 + $0x168] ss:$16 sps:$4 sm:$0xff]  }
  0x4a   :  { %1235 = vmatprep.subr.bf16.mxu0 %v1440_v6  ;;  %1276 = vmatprep.subr.bf16.mxu1 %v1442_v7  ;;  %v1482_v48 = vld [vmem:[%s2230_s1 + $0x184] ss:$16 sps:$4 sm:$0xff]   ;;  %v1484_v49 = vld [vmem:[%s2230_s1 + $0x18c] ss:$16 sps:$4 sm:$0xff]   ;;  %v1492_v54 = vld [vmem:[%s2230_s1 + $0x1a0] ss:$16 sps:$4 sm:$0xff]  }
  0x4b   :  { %108 = vadd.xlane.f32.xlu1 %v107_v10  ;;  %v173_v10 = vsel %vm79_vm0, %v46_v4, 0.0  ;;  %v1488_v52 = vld [vmem:[%s2230_s1 + $0x1a4] ss:$16 sps:$4 sm:$0xff]   ;;  %v1490_v53 = vld [vmem:[%s2230_s1 + $0x1ac] ss:$16 sps:$4 sm:$0xff]  }
  0x4c   :  { %105 = vadd.xlane.f32.xlu0 %v104_v11  ;;  %v170_v11 = vsel %vm79_vm0, %v45_v5, 0.0  ;;  %v1493_v55 = vld [vmem:[%s2230_s1 + $0x1a8] ss:$16 sps:$4 sm:$0xff]   ;;  %v1496_v60 = vld [vmem:[%s2230_s1 + $0x1cc] ss:$16 sps:$4 sm:$0xff]  }
  0x4d   :  { %1236 = vmatpush1.bf16.msra.mxu0 %v1444_v8  ;;  %1277 = vmatpush1.bf16.msra.mxu1 %v1445_v9  ;;  %v1498_v61 = vld [vmem:[%s2230_s1 + $0x1c0] ss:$16 sps:$4 sm:$0xff]   ;;  %v1499_v62 = vld [vmem:[%s2230_s1 + $0x1c8] ss:$16 sps:$4 sm:$0xff]   ;;  %v1500_v63 = vld [vmem:[%s2230_s1 + $0x1e4] ss:$16 sps:$4 sm:$0xff]  }
  0x4e   :  { %v1502_v0 = vld [vmem:[%s2230_s1 + $0x1ec] ss:$16 sps:$4 sm:$0xff]   ;;  %v1504_v8 = vld [vmem:[%s2230_s1 + $0x1e0] ss:$16 sps:$4 sm:$0xff]   ;;  %v1505_v9 = vld [vmem:[%s2230_s1 + $0x1e8] ss:$16 sps:$4 sm:$0xff]  }
  0x4f   :  { %204 = vadd.xlane.f32.xlu1 %v203_v14  ;;  %v1446_v14 = vld [vmem:[%s2230_s1 + $0xc4] ss:$16 sps:$4 sm:$0xff]  }
  0x50   :  { %201 = vadd.xlane.f32.xlu0 %v200_v15  ;;  %v1448_v15 = vld [vmem:[%s2230_s1 + $0xcc] ss:$16 sps:$4 sm:$0xff]   ;;  %1237 = vmatprep.subr.bf16.mxu0 %v1446_v14 }
  0x51   :  { %1278 = vmatprep.subr.bf16.mxu1 %v1448_v15  ;;  %1238 = vmatpush1.bf16.msra.mxu0 %v1450_v16 }
  0x52   :  { %1279 = vmatpush1.bf16.msra.mxu1 %v1451_v17 }
  0x53   :  { %162 = vadd.xlane.f32.xlu1 %v161_v18  ;;  %v269_v18 = vsel %vm79_vm0, %v78_v12, 0.0 }
  0x54   :  { %159 = vadd.xlane.f32.xlu0 %v158_v19  ;;  %v266_v19 = vsel %vm79_vm0, %v77_v13, 0.0 }
  0x57   :  { %258 = vadd.xlane.f32.xlu1 %v257_v22  ;;  %v1452_v22 = vld [vmem:[%s2230_s1 + $0xe4] ss:$16 sps:$4 sm:$0xff]  }
  0x58   :  { %255 = vadd.xlane.f32.xlu0 %v254_v23  ;;  %v1454_v23 = vld [vmem:[%s2230_s1 + $0xec] ss:$16 sps:$4 sm:$0xff]   ;;  %1239 = vmatprep.subr.bf16.mxu0 %v1452_v22 }
  0x59   :  { %1280 = vmatprep.subr.bf16.mxu1 %v1454_v23  ;;  %1240 = vmatpush1.bf16.msra.mxu0 %v1456_v24 }
  0x5a   :  { %1281 = vmatpush1.bf16.msra.mxu1 %v1457_v25  ;;  %1241 = vmatprep.subr.bf16.mxu0 %v1458_v30 }
  0x5b   :  { %114 = vadd.xlane.f32.xlu1 %v113_v26  ;;  %v125_v26 = vsel %vm79_vm0, %v30_v20, 0.0  ;;  %1282 = vmatprep.subr.bf16.mxu1 %v1460_v31 }
  0x5c   :  { %111 = vadd.xlane.f32.xlu0 %v110_v27  ;;  %v122_v27 = vsel %vm79_vm0, %v29_v21, 0.0 }
  0x5d   :  { %1242 = vmatpush1.bf16.msra.mxu0 %v1462_v32 }
  0x5e   :  { %1283 = vmatpush1.bf16.msra.mxu1 %v1463_v33  ;;  %1243 = vmatprep.subr.bf16.mxu0 %v1464_v36 }
  0x5f   :  { %210 = vadd.xlane.f32.xlu1 %v209_v34  ;;  %v221_v34 = vsel %vm79_vm0, %v62_v28, 0.0  ;;  %1284 = vmatprep.subr.bf16.mxu1 %v1466_v37 }
  0x60   :  { %207 = vadd.xlane.f32.xlu0 %v206_v35  ;;  %v218_v35 = vsel %vm79_vm0, %v61_v29, 0.0  ;;  %vm898_vm0 = vcmask 1041409  }
  0x61   :  { %1244 = vmatpush1.bf16.msra.mxu0 %v1468_v38 }
  0x62   :  { %1285 = vmatpush1.bf16.msra.mxu1 %v1469_v39  ;;  %1245 = vmatprep.subr.bf16.mxu0 %v1470_v40 }
  0x63   :  { %168 = vadd.xlane.f32.xlu1 %v167_v42  ;;  %v1474_v42 = vld [vmem:[%s2230_s1 + $0x140] ss:$16 sps:$4 sm:$0xff]   ;;  %1286 = vmatprep.subr.bf16.mxu1 %v1472_v41 }
  0x64   :  { %165 = vadd.xlane.f32.xlu0 %v164_v43  ;;  %v1475_v43 = vld [vmem:[%s2230_s1 + $0x148] ss:$16 sps:$4 sm:$0xff]  }
  0x65   :  { %1246 = vmatpush1.bf16.msra.mxu0 %v1474_v42 }
  0x66   :  { %1287 = vmatpush1.bf16.msra.mxu1 %v1475_v43  ;;  %1247 = vmatprep.subr.bf16.mxu0 %v1476_v44 }
  0x67   :  { %264 = vadd.xlane.f32.xlu1 %v263_v50  ;;  %1288 = vmatprep.subr.bf16.mxu1 %v1478_v45  ;;  %v1486_v50 = vld [vmem:[%s2230_s1 + $0x180] ss:$16 sps:$4 sm:$0xff]  }
  0x68   :  { %261 = vadd.xlane.f32.xlu0 %v260_v51  ;;  %v1487_v51 = vld [vmem:[%s2230_s1 + $0x188] ss:$16 sps:$4 sm:$0xff]  }
  0x69   :  { %1248 = vmatpush1.bf16.msra.mxu0 %v1480_v46 }
  0x6a   :  { %1289 = vmatpush1.bf16.msra.mxu1 %v1481_v47  ;;  %1249 = vmatprep.subr.bf16.mxu0 %v1482_v48 }
  0x6b   :  { %120 = vadd.xlane.f32.xlu1 %v119_v58  ;;  %1290 = vmatprep.subr.bf16.mxu1 %v1484_v49  ;;  %v434_v58 = vlaneseq }
  0x6c   :  { %117 = vadd.xlane.f32.xlu0 %v116_v59  ;;  %v1494_v59 = vld [vmem:[%s2230_s1 + $0x1c4] ss:$16 sps:$4 sm:$0xff]  }
  0x6d   :  { %1250 = vmatpush1.bf16.msra.mxu0 %v1486_v50 }
  0x6e   :  { %1291 = vmatpush1.bf16.msra.mxu1 %v1487_v51  ;;  %1251 = vmatprep.subr.bf16.mxu0 %v1488_v52 }
  0x6f   :  { %216 = vadd.xlane.f32.xlu1 %v215_v2  ;;  %1292 = vmatprep.subr.bf16.mxu1 %v1490_v53 }
  0x70   :  { %213 = vadd.xlane.f32.xlu0 %v212_v3  ;;  %v1994_v3 = vand.u32 127, %v434_v58 }
  0x71   :  { %1252 = vmatpush1.bf16.msra.mxu0 %v1492_v54 }
  0x72   :  { %1293 = vmatpush1.bf16.msra.mxu1 %v1493_v55  ;;  %1253 = vmatprep.subr.bf16.mxu0 %v1494_v59  ;;  %v556_v13 = vadd.s32 4294967288, %v1994_v3  ;;  %v570_v20 = vadd.s32 4294967272, %v1994_v3 }
  0x73   :  { %174 = vadd.xlane.f32.xlu1 %v173_v10  ;;  %1294 = vmatprep.subr.bf16.mxu1 %v1496_v60  ;;  %v2002_v10 = vshrl.u32 %v434_v58, 7 }
  0x74   :  { %171 = vadd.xlane.f32.xlu0 %v170_v11 }
  0x75   :  { %1254 = vmatpush1.bf16.msra.mxu0 %v1498_v61  ;;  %v2012_v21 = vsub.s32 %v556_v13, %v2002_v10  ;;  %v2018_v30 = vsub.s32 %v570_v20, %v2002_v10 }
  0x76   :  { %1295 = vmatpush1.bf16.msra.mxu1 %v1499_v62  ;;  %1255 = vmatprep.subr.bf16.mxu0 %v1500_v63 }
  0x77   :  { %270 = vadd.xlane.f32.xlu1 %v269_v18  ;;  %1296 = vmatprep.subr.bf16.mxu1 %v1502_v0  ;;  %v2007_v18 = vsub.s32 %v1994_v3, %v2002_v10 }
  0x78   :  { %267 = vadd.xlane.f32.xlu0 %v266_v19  ;;  %v563_v19 = vadd.s32 4294967280, %v1994_v3 }
  0x79   :  { %1256 = vmatpush1.bf16.msra.mxu0 %v1504_v8 }
  0x7a   :  { %1297 = vmatpush1.bf16.msra.mxu1 %v1505_v9  ;;  %v2015_v29 = vsub.s32 %v563_v19, %v2002_v10 }
  0x7b   :  { %126 = vadd.xlane.f32.xlu1 %v125_v26 }
  0x7c   :  { %123 = vadd.xlane.f32.xlu0 %v122_v27 }
  0x7f   :  { %222 = vadd.xlane.f32.xlu1 %v221_v34 }
  0x80   :  { %219 = vadd.xlane.f32.xlu0 %v218_v35 }
  0x90   :  { %v226_v56 = vpop.xlane.xlu1 %225 }
  0x91   :  { %v130_v57 = vpop.xlane.xlu0 %129  ;;  %v320_v1 = vmul.f32 0.015625, %v226_v56 }
  0x92   :  { %v288_v2 = vmul.f32 0.015625, %v130_v57 }
  0x94   :  { %v229_v4 = vpop.xlane.xlu1 %228 }
  0x95   :  { %v133_v5 = vpop.xlane.xlu0 %132  ;;  %v321_v6 = vmul.f32 0.015625, %v229_v4 }
  0x96   :  { %v289_v7 = vmul.f32 0.015625, %v133_v5 }
  0x97   :  { %v360_v11 = vpack.c.bf16 %v321_v6, %v320_v1 }
  0x98   :  { %v344_v12 = vpack.c.bf16 %v289_v7, %v288_v2  ;;  %v85_v14 = vpop.xlane.xlu1 %84 }
  0x99   :  { %v82_v15 = vpop.xlane.xlu0 %81  ;;  %v273_v16 = vmul.f32 0.015625, %v85_v14  ;;  %v534_v40 = vunpack.c.l.b16 %v360_v11  ;;  %v535_v41 = vunpack.c.h.b16 %v360_v11 }
  0x9a   :  { %v272_v17 = vmul.f32 0.015625, %v82_v15  ;;  %v502_v22 = vunpack.c.l.b16 %v344_v12  ;;  %v503_v23 = vunpack.c.h.b16 %v344_v12 }
  0x9b   :  { %v822_v52 = vrot.slane %v534_v40, %v2007_v18  ;;  %v826_v53 = vrot.slane %v535_v41, %v2012_v21 }
  0x9c   :  { %v336_v24 = vpack.c.bf16 %v273_v16, %v272_v17  ;;  %v139_v25 = vpop.xlane.xlu1 %138  ;;  %v664_v32 = vrot.slane %v502_v22, %v2007_v18  ;;  %v668_v33 = vrot.slane %v503_v23, %v2012_v21  ;;  %v577_v16 = vadd.s32 4294967264, %v1994_v3 }
  0x9d   :  { %v136_v26 = vpop.xlane.xlu0 %135  ;;  %v291_v27 = vmul.f32 0.015625, %v139_v25  ;;  %v827_v63 = vsel %vm561_vm1, %v826_v53, %v822_v52 }
  0x9e   :  { %v290_v28 = vmul.f32 0.015625, %v136_v26  ;;  %v669_v45 = vsel %vm561_vm1, %v668_v33, %v664_v32  ;;  %v486_v54 = vunpack.c.l.b16 %v336_v24  ;;  %v487_v55 = vunpack.c.h.b16 %v336_v24 }
  0xa0   :  { %v345_v31 = vpack.c.bf16 %v291_v27, %v290_v28  ;;  %v181_v34 = vpop.xlane.xlu1 %180  ;;  %v555_v0 = vrot.slane %v486_v54, %v2007_v18  ;;  %v560_v1 = vrot.slane %v487_v55, %v2012_v21  ;;  %v584_v27 = vadd.s32 4294967256, %v1994_v3 }
  0xa1   :  { %v178_v35 = vpop.xlane.xlu0 %177  ;;  %v305_v38 = vmul.f32 0.015625, %v181_v34 }
  0xa2   :  { %v504_v36 = vunpack.c.l.b16 %v345_v31  ;;  %v505_v37 = vunpack.c.h.b16 %v345_v31  ;;  %v304_v39 = vmul.f32 0.015625, %v178_v35  ;;  %v562_v23 = vsel %vm561_vm1, %v560_v1, %v555_v0 }
  0xa4   :  { %v673_v42 = vrot.slane %v504_v36, %v2015_v29  ;;  %v678_v43 = vrot.slane %v505_v37, %v2018_v30  ;;  %v352_v44 = vpack.c.bf16 %v305_v38, %v304_v39  ;;  %v235_v46 = vpop.xlane.xlu1 %234  ;;  %v587_v39 = vsub.s32 %v584_v27, %v2002_v10 }
  0xa5   :  { %v232_v47 = vpop.xlane.xlu0 %231  ;;  %v323_v49 = vmul.f32 0.015625, %v235_v46 }
  0xa6   :  { %v674_v48 = vsel %vm568_vm2, %v673_v42, %v669_v45  ;;  %v322_v51 = vmul.f32 0.015625, %v232_v47  ;;  %v518_v4 = vunpack.c.l.b16 %v352_v44  ;;  %v519_v5 = vunpack.c.h.b16 %v352_v44 }
  0xa7   :  { %v2027_v50 = vsel %vm575_vm3, %v678_v43, %v674_v48 }
  0xa8   :  { %v361_v56 = vpack.c.bf16 %v323_v49, %v322_v51  ;;  %v91_v57 = vpop.xlane.xlu1 %90  ;;  %v743_v24 = vrot.slane %v518_v4, %v2007_v18  ;;  %v747_v25 = vrot.slane %v519_v5, %v2012_v21  ;;  %v580_v21 = vsub.s32 %v577_v16, %v2002_v10 }
  0xa9   :  { %v88_v58 = vpop.xlane.xlu0 %87  ;;  %v275_v59 = vmul.f32 0.015625, %v91_v57 }
  0xaa   :  { %v274_v60 = vmul.f32 0.015625, %v88_v58  ;;  %v536_v61 = vunpack.c.l.b16 %v361_v56  ;;  %v537_v62 = vunpack.c.h.b16 %v361_v56  ;;  %v748_v18 = vsel %vm561_vm1, %v747_v25, %v743_v24 }
  0xac   :  { %v337_v2 = vpack.c.bf16 %v275_v59, %v274_v60  ;;  %v831_v6 = vrot.slane %v536_v61, %v2015_v29  ;;  %v836_v7 = vrot.slane %v537_v62, %v2018_v30  ;;  %v187_v8 = vpop.xlane.xlu1 %186 }
  0xad   :  { %v184_v9 = vpop.xlane.xlu0 %183  ;;  %v307_v13 = vmul.f32 0.015625, %v187_v8 }
  0xae   :  { %v488_v11 = vunpack.c.l.b16 %v337_v2  ;;  %v489_v12 = vunpack.c.h.b16 %v337_v2  ;;  %v306_v14 = vmul.f32 0.015625, %v184_v9  ;;  %v832_v15 = vsel %vm568_vm2, %v831_v6, %v827_v63 }
  0xaf   :  { %v837_v17 = vsel %vm575_vm3, %v836_v7, %v832_v15 }
  0xb0   :  { %v567_v19 = vrot.slane %v488_v11, %v2015_v29  ;;  %v574_v20 = vrot.slane %v489_v12, %v2018_v30  ;;  %v353_v22 = vpack.c.bf16 %v307_v13, %v306_v14  ;;  %v145_v26 = vpop.xlane.xlu1 %144 }
  0xb1   :  { %v142_v28 = vpop.xlane.xlu0 %141  ;;  %v293_v34 = vmul.f32 0.015625, %v145_v26 }
  0xb2   :  { %v569_v31 = vsel %vm568_vm2, %v567_v19, %v562_v23  ;;  %v520_v32 = vunpack.c.l.b16 %v353_v22  ;;  %v521_v33 = vunpack.c.h.b16 %v353_v22  ;;  %v292_v36 = vmul.f32 0.015625, %v142_v28 }
  0xb3   :  { %v576_v35 = vsel %vm575_vm3, %v574_v20, %v569_v31 }
  0xb4   :  { %v752_v37 = vrot.slane %v520_v32, %v2015_v29  ;;  %v757_v38 = vrot.slane %v521_v33, %v2018_v30  ;;  %v346_v40 = vpack.c.bf16 %v293_v34, %v292_v36  ;;  %v241_v41 = vpop.xlane.xlu1 %240 }
  0xb5   :  { %v238_v42 = vpop.xlane.xlu0 %237  ;;  %v325_v44 = vmul.f32 0.015625, %v241_v41 }
  0xb6   :  { %v753_v43 = vsel %vm568_vm2, %v752_v37, %v748_v18  ;;  %v324_v45 = vmul.f32 0.015625, %v238_v42  ;;  %v506_v47 = vunpack.c.l.b16 %v346_v40  ;;  %v507_v48 = vunpack.c.h.b16 %v346_v40 }
  0xb7   :  { %v758_v46 = vsel %vm575_vm3, %v757_v38, %v753_v43  ;;  %v591_v42 = vadd.s32 4294967248, %v1994_v3  ;;  %v598_v43 = vadd.s32 4294967240, %v1994_v3 }
  0xb8   :  { %v362_v29 = vpack.c.bf16 %v325_v44, %v324_v45  ;;  %v683_v30 = vrot.slane %v506_v47, %v580_v21  ;;  %v688_v49 = vrot.slane %v507_v48, %v587_v39  ;;  %v97_v51 = vpop.xlane.xlu1 %96  ;;  %v605_v44 = vadd.s32 4294967232, %v1994_v3 }
  0xb9   :  { %v94_v52 = vpop.xlane.xlu0 %93  ;;  %v277_v55 = vmul.f32 0.015625, %v97_v51  ;;  %v619_v47 = vadd.s32 4294967216, %v1994_v3 }
  0xba   :  { %v538_v53 = vunpack.c.l.b16 %v362_v29  ;;  %v539_v54 = vunpack.c.h.b16 %v362_v29  ;;  %v276_v56 = vmul.f32 0.015625, %v94_v52  ;;  %v684_v57 = vsel %vm582_vm4, %v683_v30, %v2027_v50 }
  0xbb   :  { %v2057_v58 = vsel %vm589_vm5, %v688_v49, %v684_v57 }
  0xbc   :  { %v841_v59 = vrot.slane %v538_v53, %v580_v21  ;;  %v846_v60 = vrot.slane %v539_v54, %v587_v39  ;;  %v338_v61 = vpack.c.bf16 %v277_v55, %v276_v56  ;;  %v193_v62 = vpop.xlane.xlu1 %192  ;;  %v594_v54 = vsub.s32 %v591_v42, %v2002_v10 }
  0xbd   :  { %v190_v63 = vpop.xlane.xlu0 %189  ;;  %v309_v4 = vmul.f32 0.015625, %v193_v62  ;;  %v2086_v55 = vsub.s32 %v598_v43, %v2002_v10  ;;  %v2089_v56 = vsub.s32 %v605_v44, %v2002_v10 }
  0xbe   :  { %v842_v0 = vsel %vm582_vm4, %v841_v59, %v837_v17  ;;  %v490_v1 = vunpack.c.l.b16 %v338_v61  ;;  %v491_v2 = vunpack.c.h.b16 %v338_v61  ;;  %v308_v6 = vmul.f32 0.015625, %v190_v63 }
  0xbf   :  { %v2061_v5 = vsel %vm589_vm5, %v846_v60, %v842_v0  ;;  %v2095_v60 = vsub.s32 %v619_v47, %v2002_v10  ;;  %v626_v61 = vadd.s32 4294967208, %v1994_v3  ;;  %v633_v0 = vadd.s32 4294967200, %v1994_v3 }
  0xc0   :  { %v581_v7 = vrot.slane %v490_v1, %v580_v21  ;;  %v588_v8 = vrot.slane %v491_v2, %v587_v39  ;;  %v354_v50 = vpack.c.bf16 %v309_v4, %v308_v6  ;;  %v151_v9 = vpop.xlane.xlu1 %150  ;;  %v640_v1 = vadd.s32 4294967192, %v1994_v3 }
  0xc1   :  { %v148_v11 = vpop.xlane.xlu0 %147  ;;  %v295_v38 = vmul.f32 0.015625, %v151_v9 }
  0xc2   :  { %v583_v12 = vsel %vm582_vm4, %v581_v7, %v576_v35  ;;  %v522_v14 = vunpack.c.l.b16 %v354_v50  ;;  %v523_v15 = vunpack.c.h.b16 %v354_v50  ;;  %v294_v18 = vmul.f32 0.015625, %v148_v11 }
  0xc3   :  { %v2065_v13 = vsel %vm589_vm5, %v588_v8, %v583_v12  ;;  %v647_v8 = vadd.s32 4294967184, %v1994_v3  ;;  %v654_v50 = vadd.s32 4294967176, %v1994_v3 }
  0xc4   :  { %v762_v16 = vrot.slane %v522_v14, %v580_v21  ;;  %v767_v17 = vrot.slane %v523_v15, %v587_v39  ;;  %v247_v19 = vpop.xlane.xlu1 %246  ;;  %v347_v45 = vpack.c.bf16 %v295_v38, %v294_v18 }
  0xc5   :  { %v244_v20 = vpop.xlane.xlu0 %243  ;;  %v327_v21 = vmul.f32 0.015625, %v247_v19  ;;  %v2103_v19 = vsub.s32 %v626_v61, %v2002_v10 }
  0xc6   :  { %v763_v22 = vsel %vm582_vm4, %v762_v16, %v758_v46  ;;  %v326_v39 = vmul.f32 0.015625, %v244_v20  ;;  %v612_v46 = vadd.s32 4294967224, %v1994_v3  ;;  %v508_v57 = vunpack.c.l.b16 %v347_v45 }
  0xc7   :  { %v2069_v23 = vsel %vm589_vm5, %v767_v17, %v763_v22  ;;  %v509_v2 = vunpack.c.h.b16 %v347_v45 }
  0xc8   :  { %v103_v24 = vpop.xlane.xlu1 %102  ;;  %v363_v48 = vpack.c.bf16 %v327_v21, %v326_v39  ;;  %v2092_v59 = vsub.s32 %v612_v46, %v2002_v10  ;;  %v693_v15 = vrot.slane %v508_v57, %v594_v54 }
  0xc9   :  { %v100_v25 = vpop.xlane.xlu0 %99  ;;  %v279_v29 = vmul.f32 0.015625, %v103_v24 }
  0xca   :  { %v278_v30 = vmul.f32 0.015625, %v100_v25  ;;  %v540_v62 = vunpack.c.l.b16 %v363_v48  ;;  %v541_v20 = vunpack.c.h.b16 %v363_v48  ;;  %v2106_v25 = vsub.s32 %v633_v0, %v2002_v10 }
  0xcb   :  { %v694_v18 = vsel %vm596_vm6, %v693_v15, %v2057_v58 }
  0xcc   :  { %v199_v26 = vpop.xlane.xlu1 %198  ;;  %v339_v63 = vpack.c.bf16 %v279_v29, %v278_v30  ;;  %v851_v22 = vrot.slane %v540_v62, %v594_v54  ;;  %v856_v44 = vrot.slane %v541_v20, %v2086_v55 }
  0xcd   :  { %v196_v27 = vpop.xlane.xlu0 %195  ;;  %v311_v49 = vmul.f32 0.015625, %v199_v26 }
  0xce   :  { %v310_v51 = vmul.f32 0.015625, %v196_v27  ;;  %v492_v24 = vunpack.c.l.b16 %v339_v63  ;;  %v493_v26 = vunpack.c.h.b16 %v339_v63  ;;  %v852_v43 = vsel %vm596_vm6, %v851_v22, %v2061_v5 }
  0xd0   :  { %v157_v28 = vpop.xlane.xlu1 %156  ;;  %v355_v4 = vpack.c.bf16 %v311_v49, %v310_v51  ;;  %v595_v45 = vrot.slane %v492_v24, %v594_v54  ;;  %v602_v47 = vrot.slane %v493_v26, %v2086_v55 }
  0xd1   :  { %v154_v31 = vpop.xlane.xlu0 %153  ;;  %v297_v9 = vmul.f32 0.015625, %v157_v28  ;;  %v2113_v28 = vsub.s32 %v640_v1, %v2002_v10 }
  0xd2   :  { %v296_v11 = vmul.f32 0.015625, %v154_v31  ;;  %v524_v27 = vunpack.c.l.b16 %v355_v4  ;;  %v2116_v31 = vsub.s32 %v647_v8, %v2002_v10  ;;  %v525_v46 = vunpack.c.h.b16 %v355_v4 }
  0xd4   :  { %v253_v32 = vpop.xlane.xlu1 %252  ;;  %v772_v48 = vrot.slane %v524_v27, %v594_v54  ;;  %v597_v54 = vsel %vm596_vm6, %v595_v45, %v2065_v13 }
  0xd5   :  { %v250_v33 = vpop.xlane.xlu0 %249  ;;  %v329_v12 = vmul.f32 0.015625, %v253_v32  ;;  %v698_v32 = vrot.slane %v509_v2, %v2086_v55  ;;  %v604_v13 = vsel %vm603_vm7, %v602_v47, %v597_v54 }
  0xd6   :  { %v328_v14 = vmul.f32 0.015625, %v250_v33  ;;  %v348_v33 = vpack.c.bf16 %v297_v9, %v296_v11  ;;  %v773_v2 = vsel %vm596_vm6, %v772_v48, %v2069_v23 }
  0xd7   :  { %v699_v0 = vsel %vm603_vm7, %v698_v32, %v694_v18 }
  0xd8   :  { %v109_v34 = vpop.xlane.xlu1 %108  ;;  %v511_v1 = vunpack.c.h.b16 %v348_v33 }
  0xd9   :  { %v106_v35 = vpop.xlane.xlu0 %105  ;;  %v281_v16 = vmul.f32 0.015625, %v109_v34  ;;  %v364_v34 = vpack.c.bf16 %v329_v12, %v328_v14 }
  0xda   :  { %v280_v17 = vmul.f32 0.015625, %v106_v35  ;;  %v2120_v35 = vsub.s32 %v654_v50, %v2002_v10  ;;  %v708_v23 = vrot.slane %v511_v1, %v2092_v59 }
  0xdb   :  { %v542_v51 = vunpack.c.l.b16 %v364_v34  ;;  %v543_v4 = vunpack.c.h.b16 %v364_v34 }
  0xdc   :  { %v2071_v36 = vpop.xlane.xlu1 %204  ;;  %v340_v21 = vpack.c.bf16 %v281_v16, %v280_v17 }
  0xdd   :  { %v2073_v37 = vpop.xlane.xlu0 %201  ;;  %v313_v39 = vmul.f32 0.015625, %v2071_v36  ;;  %v510_v36 = vunpack.c.l.b16 %v348_v33  ;;  %v866_v17 = vrot.slane %v543_v4, %v2092_v59 }
  0xde   :  { %v312_v42 = vmul.f32 0.015625, %v2073_v37  ;;  %v494_v61 = vunpack.c.l.b16 %v340_v21  ;;  %v495_v50 = vunpack.c.h.b16 %v340_v21 }
  0xe0   :  { %v2075_v40 = vpop.xlane.xlu1 %162  ;;  %v356_v5 = vpack.c.bf16 %v313_v39, %v312_v42  ;;  %v616_v34 = vrot.slane %v495_v50, %v2092_v59 }
  0xe1   :  { %v2077_v41 = vpop.xlane.xlu0 %159  ;;  %v299_v29 = vmul.f32 0.015625, %v2075_v40  ;;  %v777_v40 = vrot.slane %v525_v46, %v2086_v55  ;;  %v609_v55 = vrot.slane %v494_v61, %v2089_v56 }
  0xe2   :  { %v298_v58 = vmul.f32 0.015625, %v2077_v41  ;;  %v857_v41 = vsel %vm603_vm7, %v856_v44, %v852_v43  ;;  %v526_v11 = vunpack.c.l.b16 %v356_v5  ;;  %v527_v39 = vunpack.c.h.b16 %v356_v5 }
  0xe3   :  { %v778_v14 = vsel %vm603_vm7, %v777_v40, %v773_v2  ;;  %v611_v21 = vsel %vm610_vm8, %v609_v55, %v604_v13 }
  0xe4   :  { %v259_v52 = vpop.xlane.xlu1 %258  ;;  %v782_v42 = vrot.slane %v526_v11, %v2089_v56 }
  0xe5   :  { %v256_v53 = vpop.xlane.xlu0 %255  ;;  %v331_v37 = vmul.f32 0.015625, %v259_v52  ;;  %v349_v52 = vpack.c.bf16 %v299_v29, %v298_v58 }
  0xe6   :  { %v330_v57 = vmul.f32 0.015625, %v256_v53 }
  0xe7   :  { %v512_v20 = vunpack.c.l.b16 %v349_v52  ;;  %v513_v44 = vunpack.c.h.b16 %v349_v52 }
  0xe8   :  { %v115_v6 = vpop.xlane.xlu1 %114  ;;  %v365_v9 = vpack.c.bf16 %v331_v37, %v330_v57 }
  0xe9   :  { %v112_v7 = vpop.xlane.xlu0 %111  ;;  %v283_v62 = vmul.f32 0.015625, %v115_v6  ;;  %v703_v6 = vrot.slane %v510_v36, %v2089_v56  ;;  %v713_v58 = vrot.slane %v512_v20, %v2095_v60 }
  0xea   :  { %v282_v63 = vmul.f32 0.015625, %v112_v7  ;;  %v861_v7 = vrot.slane %v542_v51, %v2089_v56  ;;  %v544_v18 = vunpack.c.l.b16 %v365_v9  ;;  %v618_v51 = vsel %vm617_vm9, %v616_v34, %v611_v21 }
  0xeb   :  { %v704_v32 = vsel %vm610_vm8, %v703_v6, %v699_v0  ;;  %v545_v56 = vunpack.c.h.b16 %v365_v9 }
  0xec   :  { %v2108_v38 = vpop.xlane.xlu1 %210  ;;  %v341_v12 = vpack.c.bf16 %v283_v62, %v282_v63  ;;  %v862_v33 = vsel %vm610_vm8, %v861_v7, %v857_v41  ;;  %v709_v48 = vsel %vm617_vm9, %v708_v23, %v704_v32  ;;  %v871_v37 = vrot.slane %v544_v18, %v2095_v60 }
  0xed   :  { %v2110_v3 = vpop.xlane.xlu0 %207  ;;  %v315_v45 = vmul.f32 0.015625, %v2108_v38  ;;  %v867_v29 = vsel %vm617_vm9, %v866_v17, %v862_v33  ;;  %v787_v38 = vrot.slane %v527_v39, %v2092_v59  ;;  %v783_v62 = vsel %vm610_vm8, %v782_v42, %v778_v14 }
  0xee   :  { %v496_v43 = vunpack.c.l.b16 %v341_v12  ;;  %v314_v46 = vmul.f32 0.015625, %v2110_v3  ;;  %v497_v57 = vunpack.c.h.b16 %v341_v12  ;;  %v718_v63 = vrot.slane %v513_v44, %v2103_v19 }
  0xef   :  { %v714_v40 = vsel %vm624_vm10, %v713_v58, %v709_v48  ;;  %v872_v59 = vsel %vm624_vm10, %v871_v37, %v867_v29  ;;  %v788_v55 = vsel %vm617_vm9, %v787_v38, %v783_v62 }
  0xf0   :  { %v169_v30 = vpop.xlane.xlu1 %168  ;;  %v623_v3 = vrot.slane %v496_v43, %v2095_v60  ;;  %v357_v0 = vpack.c.bf16 %v315_v45, %v314_v46  ;;  %v719_v11 = vsel %vm631_vm11, %v718_v63, %v714_v40 }
  0xf1   :  { %v166_v49 = vpop.xlane.xlu0 %165  ;;  %v301_v15 = vmul.f32 0.015625, %v169_v30 }
  0xf2   :  { %v300_v16 = vmul.f32 0.015625, %v166_v49  ;;  %v625_v7 = vsel %vm624_vm10, %v623_v3, %v618_v51  ;;  %v528_v12 = vunpack.c.l.b16 %v357_v0  ;;  %v529_v33 = vunpack.c.h.b16 %v357_v0 }
  0xf4   :  { %v265_v53 = vpop.xlane.xlu1 %264  ;;  %v350_v47 = vpack.c.bf16 %v301_v15, %v300_v16  ;;  %v792_v39 = vrot.slane %v528_v12, %v2095_v60 }
  0xf5   :  { %v262_v8 = vpop.xlane.xlu0 %261  ;;  %v333_v22 = vmul.f32 0.015625, %v265_v53  ;;  %v876_v53 = vrot.slane %v545_v56, %v2103_v19  ;;  %v797_v56 = vrot.slane %v529_v33, %v2103_v19 }
  0xf6   :  { %v332_v24 = vmul.f32 0.015625, %v262_v8  ;;  %v514_v54 = vunpack.c.l.b16 %v350_v47  ;;  %v630_v8 = vrot.slane %v497_v57, %v2103_v19  ;;  %v515_v50 = vunpack.c.h.b16 %v350_v47 }
  0xf7   :  { %v793_v62 = vsel %vm624_vm10, %v792_v39, %v788_v55  ;;  %v1530_v39 = vmov 1983009808  }
  0xf8   :  { %v121_v26 = vpop.xlane.xlu1 %120  ;;  %v366_v30 = vpack.c.bf16 %v333_v22, %v332_v24  ;;  %v723_v14 = vrot.slane %v514_v54, %v2106_v25  ;;  %v877_v24 = vsel %vm631_vm11, %v876_v53, %v872_v59  ;;  %v728_v34 = vrot.slane %v515_v50, %v2113_v28 }
  0xf9   :  { %v118_v27 = vpop.xlane.xlu0 %117  ;;  %v285_v61 = vmul.f32 0.015625, %v121_v26  ;;  %v632_v26 = vsel %vm631_vm11, %v630_v8, %v625_v7 }
  0xfa   :  { %v284_v5 = vmul.f32 0.015625, %v118_v27  ;;  %v546_v1 = vunpack.c.l.b16 %v366_v30  ;;  %v547_v23 = vunpack.c.h.b16 %v366_v30  ;;  %v724_v44 = vsel %vm638_vm12, %v723_v14, %v719_v11 }
  0xfb   :  { %v729_v57 = vsel %vm645_vm13, %v728_v34, %v724_v44  ;;  %v432_v34 = vld [vmem:[%s2231_s2] sm:$0xf]  ;;  %s1531_s2 = smov [#allocation2]  }
  0xfc   :  { %v217_v49 = vpop.xlane.xlu1 %216  ;;  %v342_v9 = vpack.c.bf16 %v285_v61, %v284_v5  ;;  %v881_v15 = vrot.slane %v546_v1, %v2106_v25  ;;  %v886_v45 = vrot.slane %v547_v23, %v2113_v28  ;;  %s1336_s23 = sshll.u32 %s1531_s2, 4  ;;  %s1337_s23 = int_to_ptr.vmem [resolvable:$true] %s1336_s23 }
  0xfd   :  { %v214_v36 = vpop.xlane.xlu0 %213  ;;  %v317_v41 = vmul.f32 0.015625, %v217_v49  ;;  %s1506_s24 = scalar_lea.vmem %s1337_s23, 128  ;;  %p1511_p1 = scmp.lt.s32.totalorder %s1337_s23, %s1337_s23 }
  0xfe   :  { %v316_v2 = vmul.f32 0.015625, %v214_v36  ;;  %v498_v18 = vunpack.c.l.b16 %v342_v9  ;;  %v882_v58 = vsel %vm638_vm12, %v881_v15, %v877_v24  ;;  %v499_v60 = vunpack.c.h.b16 %v342_v9  ;;  %p1507_p0 = scmp.ne.s32.totalorder %s1337_s23, %s1506_s24  ;;  %p1512_p2 = scmp.lt.s32.totalorder %s1506_s24, %s1506_s24 }
  0xff   :  { %v887_v19 = vsel %vm645_vm13, %v886_v45, %v882_v58 }
 0x100   :  { %v175_v4 = vpop.xlane.xlu1 %174  ;;  %v358_v16 = vpack.c.bf16 %v317_v41, %v316_v2  ;;  %v637_v37 = vrot.slane %v498_v18, %v2106_v25  ;;  %v644_v59 = vrot.slane %v499_v60, %v2113_v28  ;;  %v440_v18 = vsub.s32 1, %v2002_v10  ;;  %p1513_p3 = por %p1512_p2, %p1511_p1 }
 0x101   :  { %v172_v52 = vpop.xlane.xlu0 %171  ;;  %v303_v6 = vmul.f32 0.015625, %v175_v4 }
 0x102   :  { %v302_v13 = vmul.f32 0.015625, %v172_v52  ;;  %v530_v46 = vunpack.c.l.b16 %v358_v16  ;;  %v531_v63 = vunpack.c.h.b16 %v358_v16  ;;  %v639_v52 = vsel %vm638_vm12, %v637_v37, %v632_v26  ;;  %p1514_p4 = pnand %p1513_p3, %p1507_p0 }
 0x103   :  { %v646_v16 = vsel %vm645_vm13, %v644_v59, %v639_v52  ;;  %v441_v45 = vrot.slane %v432_v34, %v440_v18 }
 0x104   :  { %v351_v17 = vpack.c.bf16 %v303_v6, %v302_v13  ;;  %v271_v20 = vpop.xlane.xlu1 %270  ;;  %v802_v1 = vrot.slane %v530_v46, %v2106_v25  ;;  %v798_v13 = vsel %vm631_vm11, %v797_v56, %v793_v62  ;;  %v807_v25 = vrot.slane %v531_v63, %v2113_v28 }
 0x105   :  { %v268_v22 = vpop.xlane.xlu0 %267  ;;  %v335_v27 = vmul.f32 0.015625, %v271_v20 }
 0x106   :  { %v334_v32 = vmul.f32 0.015625, %v268_v22  ;;  %v516_v21 = vunpack.c.l.b16 %v351_v17  ;;  %v517_v42 = vunpack.c.h.b16 %v351_v17  ;;  %v803_v11 = vsel %vm638_vm12, %v802_v1, %v798_v13 }
 0x107   :  { %v808_v28 = vsel %vm645_vm13, %v807_v25, %v803_v11 }
 0x108   :  { %v367_v43 = vpack.c.bf16 %v335_v27, %v334_v32  ;;  %v733_v47 = vrot.slane %v516_v21, %v2116_v31  ;;  %v127_v48 = vpop.xlane.xlu1 %126  ;;  %v738_v38 = vrot.slane %v517_v42, %v2120_v35  ;;  %v448_v21 = vsub.s32 3, %v2002_v10 }
 0x109   :  { %v124_v29 = vpop.xlane.xlu0 %123  ;;  %v287_v36 = vmul.f32 0.015625, %v127_v48  ;;  %v1314_v42 = vunpack.c.l.s4 %v1530_v39 }
 0x10a   :  { %v548_v30 = vunpack.c.l.b16 %v367_v43  ;;  %v549_v49 = vunpack.c.h.b16 %v367_v43  ;;  %v286_v51 = vmul.f32 0.015625, %v124_v29  ;;  %v734_v40 = vsel %vm652_vm14, %v733_v47, %v729_v57 }
 0x10b   :  { %v739_v50 = vsel %vm659_vm15, %v738_v38, %v734_v40  ;;  %v449_v46 = vrot.slane %v432_v34, %v448_v21  ;;  %v1315_v47 = vunpack.c.0.s8 %v1314_v42 }
 0x10c   :  { %v891_v3 = vrot.slane %v548_v30, %v2116_v31  ;;  %v896_v61 = vrot.slane %v549_v49, %v2120_v35  ;;  %v343_v5 = vpack.c.bf16 %v287_v36, %v286_v51  ;;  %v223_v0 = vpop.xlane.xlu1 %222 }
 0x10d   :  { %v220_v54 = vpop.xlane.xlu0 %219  ;;  %v319_v2 = vmul.f32 0.015625, %v223_v0  ;;  %v1318_v57 = vsub.s32 %v1315_v47, %v2002_v10 }
 0x10e   :  { %v500_v41 = vunpack.c.l.b16 %v343_v5  ;;  %v318_v4 = vmul.f32 0.015625, %v220_v54  ;;  %v501_v53 = vunpack.c.h.b16 %v343_v5  ;;  %v892_v8 = vsel %vm652_vm14, %v891_v3, %v887_v19 }
 0x10f   :  { %v897_v9 = vsel %vm659_vm15, %v896_v61, %v892_v8 }
 0x110   :  { %v651_v6 = vrot.slane %v500_v41, %v2116_v31  ;;  %v359_v7 = vpack.c.bf16 %v319_v2, %v318_v4  ;;  %v900_v55 = vsel %vm898_vm0, %v897_v9, %v739_v50  ;;  %v658_v15 = vrot.slane %v501_v53, %v2120_v35 }
 0x111   :  { %v902_v23 = vpack.c.b16 %v900_v55, %v900_v55 }
 0x112   :  { %v532_v12 = vunpack.c.l.b16 %v359_v7  ;;  %v533_v14 = vunpack.c.h.b16 %v359_v7  ;;  %v653_v22 = vsel %vm652_vm14, %v651_v6, %v646_v16 }
 0x113   :  { %1257 = vmatprep.mubr.bf16.mxu0 %v902_v23  ;;  %1298 = vmatprep.mubr.bf16.mxu1 %v902_v23  ;;  %v660_v26 = vsel %vm659_vm15, %v658_v15, %v653_v22 }
 0x114   :  { %v812_v17 = vrot.slane %v532_v12, %v2116_v31  ;;  %v817_v20 = vrot.slane %v533_v14, %v2120_v35  ;;  %v436_v31 = vsub.s32 0, %v2002_v10  ;;  %v444_v35 = vsub.s32 2, %v2002_v10 }
 0x116   :  { %v813_v24 = vsel %vm652_vm14, %v812_v17, %v808_v28  ;;  %v437_v43 = vrot.slane %v432_v34, %v436_v31  ;;  %v445_v44 = vrot.slane %v432_v34, %v444_v35 }
 0x117   :  { %v818_v27 = vsel %vm659_vm15, %v817_v20, %v813_v24 }
 0x118   :  { %v899_v32 = vsel %vm898_vm0, %v818_v27, %v660_v26 }
 0x119   :  { %v901_v33 = vpack.c.b16 %v899_v32, %v899_v32 }
 0x11b   :  { %1258 = vmatmul.mubr.bf16.vlgmr.msra.gmra.mrb[0].mxu0 %v901_v33  ;;  %1299 = vmatmul.mubr.bf16.vlgmr.msra.gmra.mrb[0].mxu1 %v901_v33 }
 0x1ee   :  { %v1259_v48 = vpop.f32.mrb[0].mxu0  ;;  %v1300_v29 = vpop.f32.mrb[0].mxu1 }
 0x1ef   :  { %v1260_v58 = vadd.f32 %v1259_v48, %v437_v43  ;;  %v1301_v30 = vadd.f32 %v1300_v29, %v445_v44  ;;  %v1261_v49 = vpop.f32.mrb[1].mxu0  ;;  %v1302_v36 = vpop.f32.mrb[1].mxu1 }
 0x1f0   :  { %v1262_v51 = vadd.f32 %v1261_v49, %v441_v45  ;;  %v1303_v56 = vadd.f32 %v1302_v36, %v449_v46  ;;  %v1263_v60 = vpop.f32.mrb[2].mxu0  ;;  %v1304_v37 = vpop.f32.mrb[2].mxu1 }
 0x1f1   :  { %v1264_v38 = vpop.f32.mrb[3].mxu0  ;;  %v1305_v3 = vpop.f32.mrb[3].mxu1 }
 0x1f2   :  { %v1311_v61 = vcombine.low %v1260_v58, %v1262_v51  ;;  %v1312_v5 = vcombine.low %v1301_v30, %v1303_v56 }
 0x1f4   :  { %v1319_v62 = vrot.slane %v1311_v61, %v1318_v57  ;;  %v1326_v63 = vrot.slane %v1312_v5, %v1318_v57 }
 0x1f6   :  { %v1327_v0 = vcombine.low %v1319_v62, %v1326_v63 }
 0x1f8   :  { %1329 = vst [vmem:[#allocation2] sm:$0xff] %v1327_v0 }
 0x1f9   :  { %1517 = shalt.err (!%p1514_p4)
}
 0x1fa   :  { %s1518_s27 = scalar_lea.hbm %s2232_s3, 128 }
 0x1fb   :  { %p1519_p5 = scmp.ne.s32.totalorder %s2232_s3, %s1518_s27  ;;  %p1522_p6 = scmp.lt.u32.totalorder %s1518_s27, %s2232_s3 }
 0x1fd   :  { %p1524_p7 = pnand %p1522_p6, %p1519_p5 }
 0x1ff   :  { %1527 = shalt.err (!%p1524_p7)
}
 0x200   :  { %1339 = dma.vmem_to_hbm [thread:$0]  %s1337_s23, 128, %s2232_s3, [#allocation3]  }
 0x201   :  { %1528 = dma.done.wait [#allocation3], 128  }
 0x202   :  { %1529 = vsyncadd [#allocation3], 4294967168 }
 0x203   :  { %1343 = vsyncpa [#allocation3], 1 }

</bundles_post_ra>
